<compile_context>
chip_gen: v5e
topology: v5e:2x2
jax: 0.10.0
libtpu: 0.0.40
codegen_flags: <defaults>
</compile_context>

<pallas_src>
import functools

import jax
import jax.numpy as jnp
import numpy as np
from jax.experimental import pallas as pl
from jax.experimental.pallas import tpu as pltpu

# Module constants (Conv2dPermute / get_inputs()).
N_BATCH = 2
C_IN = 2
C_OUT = 2
H = W = 4
K = 2          # kernel size (KH == KW == 2)
STRIDE = 2
PAD = 2
LANES = 128    # lane-dense width of the kernel's output slab


def _conv_gemm_kernel(w_ref, p_ref, o_ref):
    """Whole convolution (non-zero region) as one MXU GEMM.

    w_ref: (C_OUT, C_IN*K*K)   packed conv weights           -> (2, 8)
    p_ref: (C_IN*K*K, LANES)   im2col patches, lane-padded   -> (8, 128)
    o_ref: (C_OUT,   LANES)    lane-dense output slab        -> (2, 128)
    """
    o_ref[...] = jnp.dot(w_ref[...], p_ref[...],
                         preferred_element_type=jnp.float32)


@functools.partial(jax.jit, static_argnames="permute_order")
def conv2d_permute(x_nchw, w, permute_order=(0, 2, 3, 1)):
    """x_nchw: (N, C_IN, H, W) f32; w: (C_OUT, C_IN, K, K); no bias.

    Returns Conv2d(x) (stride=2, pad=2) permuted by `permute_order`.
    """
    n, c_in, h, w_sp = x_nchw.shape
    c_out, c_in_w, kh, kw = w.shape
    assert (c_in, c_in_w, c_out) == (C_IN, C_IN, C_OUT)
    assert (kh, kw) == (K, K) and STRIDE == K and PAD == STRIDE
    assert h % STRIDE == 0 and w_sp % STRIDE == 0

    oh = (h + 2 * PAD - kh) // STRIDE + 1           # 4
    ow = (w_sp + 2 * PAD - kw) // STRIDE + 1        # 4
    ih, iw = h // STRIDE, w_sp // STRIDE            # non-zero (inner) output: 2x2
    border = PAD // STRIDE                          # structurally-zero ring width: 1
    assert ih + 2 * border == oh and iw + 2 * border == ow
    n_inner = n * ih * iw                           # 8 non-zero pixels per channel

    # ---- fused wrapper-side layout plumbing (no compute, all under jit) -----
    # stride == kernel  =>  the raw planes partition exactly into KxK blocks,
    # so im2col is a pure reshape + transpose (zero data duplication).
    patches = (x_nchw.astype(jnp.float32)
               .reshape(n, c_in, ih, K, iw, K)       # (n, c, oy, kh, ox, kw)
               .transpose(1, 3, 5, 0, 2, 4)          # (c, kh, kw, n, oy, ox)
               .reshape(c_in * K * K, n_inner))      # (8, 8)
    # Lane-dense slab: pad pixel axis to 128 so the kernel store is unmasked.
    patches = jnp.pad(patches, ((0, 0), (0, LANES - n_inner)))      # (8, 128)
    w_mat = w.astype(jnp.float32).reshape(c_out, c_in * K * K)      # (2, 8)

    # ---- single gridless Pallas call: one MXU GEMM, all VMEM resident -------
    out_slab = pl.pallas_call(
        _conv_gemm_kernel,
        out_shape=jax.ShapeDtypeStruct((c_out, LANES), jnp.float32),
        in_specs=[pl.BlockSpec(memory_space=pltpu.MemorySpace.VMEM),
                  pl.BlockSpec(memory_space=pltpu.MemorySpace.VMEM)],
        out_specs=pl.BlockSpec(memory_space=pltpu.MemorySpace.VMEM),
    )(w_mat, patches)

    # ---- fused tail: re-attach the exactly-zero border, then permute --------
    y_inner = (out_slab[:, :n_inner]
               .reshape(c_out, n, ih, iw)
               .transpose(1, 0, 2, 3))               # (N, C_OUT, 2, 2)
    y = jnp.pad(y_inner,
                ((0, 0), (0, 0), (border, border), (border, border)))
    # y: (N, C_OUT, OH, OW) in NCHW, then the module's permute.
    return jnp.transpose(y, permute_order)


def _ref(x, w, permute_order):
    y = jax.lax.conv_general_dilated(
        x, w, window_strides=(STRIDE, STRIDE),
        padding=((PAD, PAD), (PAD, PAD)),
        dimension_numbers=("NCHW", "OIHW", "NCHW"))
    return jnp.transpose(y, permute_order)


if __name__ == "__main__":
    key = jax.random.PRNGKey(0)
    kx, kw_key = jax.random.split(key)

    # get_inputs(): torch.randn(2, 2, 4, 4)
    x = jax.random.normal(kx, (N_BATCH, C_IN, H, W), jnp.float32)
    # Deterministic stand-in for PyTorch's kaiming-uniform init (no bias).
    bound = 1.0 / np.sqrt(C_IN * K * K)
    w = jax.random.uniform(kw_key, (C_OUT, C_IN, K, K), jnp.float32, -bound, bound)

    permute_order = (0, 2, 3, 1)   # "channels_last", as in the test

    out = conv2d_permute(x, w, permute_order=permute_order)
    out = jax.block_until_ready(out)

    ref = _ref(x, w, permute_order)
    np.testing.assert_allclose(np.asarray(out), np.asarray(ref),
                               rtol=1e-5, atol=1e-5)
    assert out.shape == ref.shape == (N_BATCH, H, W, C_OUT)
    print("KERNEL_OK")
</pallas_src>

<mosaic_0001>
module attributes {stable_mosaic.version = 11 : i64} {
  func.func @_conv_gemm_kernel(%arg0: memref<2x8xf32, #tpu.memory_space<vmem>>, %arg1: memref<8x128xf32, #tpu.memory_space<vmem>>, %arg2: memref<2x128xf32, #tpu.memory_space<vmem>>) attributes {dimension_semantics = [], scalar_prefetch = 0 : i64, scratch_operands = 0 : i64, tpu.core_type = #tpu.core_type<tc>} {
    %c0 = arith.constant 0 : index
    %c0_0 = arith.constant 0 : index
    %0 = vector.load %arg0[%c0, %c0_0] : memref<2x8xf32, #tpu.memory_space<vmem>>, vector<2x8xf32>
    %c0_1 = arith.constant 0 : index
    %c0_2 = arith.constant 0 : index
    %1 = vector.load %arg1[%c0_1, %c0_2] : memref<8x128xf32, #tpu.memory_space<vmem>>, vector<8x128xf32>
    %cst = arith.constant dense<0.000000e+00> : vector<2x128xf32>
    %2 = tpu.matmul %0, %1, %cst {dimension_numbers = #tpu.dot_dimension_numbers<[1], [0], [0], [1], [0, 0, 1, 1], [], []>} : vector<2x8xf32>, vector<8x128xf32>, vector<2x128xf32> -> vector<2x128xf32>
    %c0_3 = arith.constant 0 : index
    %c0_4 = arith.constant 0 : index
    %3 = vector.load %arg2[%c0_3, %c0_4] : memref<2x128xf32, #tpu.memory_space<vmem>>, vector<2x128xf32>
    tpu.vector_store %arg2[%c0_3, %c0_4], %2 {strides = array<i32>} : memref<2x128xf32, #tpu.memory_space<vmem>>, vector<2x128xf32>,
    return
  }
}

</mosaic_0001>

<bundles_post_ra>
// kernel: conv2d_permute.1
= control target key start
LH: loop header
LB: loop body
LE: loop exit
PB: predicated region body
PF: predicated region fallthrough
CT: control target
= control target key end

     0   :  { %vm13_vm0 = vcmask 64512   ;;  %s67_s1 = inlined_call_operand.vmem [shape: f32[8,128], index: 1, kind: input, shape index: {}]   ;;  %s68_s0 = inlined_call_operand.vmem [shape: f32[2,8], index: 0, kind: input, shape index: {}]   ;;  %s69_s2 = inlined_call_operand.vmem [shape: f32[2,128], index: 2, kind: output, shape index: {}]  }
   0x1   :  { %v12_v0 = vld [vmem:[%s67_s1] sm:$0xff] }
   0x2   :  { %v11_v1 = vld [vmem:[%s68_s0] sm:$0x3]  ;;  %32 = vmatpush.msra.mxu0 %v12_v0 }
   0x3   :  { %42 = vmatmul.msk.f32.vlgmr.msra.gmra.mxu0 %vm13_vm0, %v11_v1 }
  0x80   :  { %v34_v2 = vpop.f32.mrf.mxu0 }
  0x81   :  { %37 = vst [vmem:[%s69_s2] sm:$0x3] %v34_v2 }

</bundles_post_ra>
